<compile_context>
chip_gen: v5e
topology: v5e:2x2
jax: 0.10.0
libtpu: 0.0.40
codegen_flags: <defaults>
</compile_context>

<pallas_src>
import functools

import numpy as np

import jax
import jax.numpy as jnp
from jax.experimental import pallas as pl
from jax.experimental.pallas import tpu as pltpu


# ----------------------------------------------------------------------------
# Shared GCN + gating tail (all in the transposed, G-on-sublanes orientation).
# ----------------------------------------------------------------------------
def _gcn_gate_from_nodes(nodes_gc, sel_gc, foldT, w1, b1col, w2t, pickg, expand):
    """nodes_gc: (G, C) normalized grouped aggregation; returns (C, 1) gate."""
    # nodesT[g, s] = nodes[s, g] = nodes_gc[g, g*S + s]
    nodesT = jnp.dot(nodes_gc * sel_gc, foldT,
                     preferred_element_type=jnp.float32)             # (G, S)
    # conv1 over the node axis (+bias), residual, ReLU
    h1 = jnp.dot(w1, nodesT, preferred_element_type=jnp.float32) + b1col  # (G, S)
    h2 = jnp.maximum(nodesT + h1, 0.0)                                # (G, S)
    # conv2 over the state axis (no bias)
    outT = jnp.dot(h2, w2t, preferred_element_type=jnp.float32)       # (G, S)
    vT = jax.nn.sigmoid(outT)                                         # (G, S): vT[g, s] = v[s, g]
    # channel c = s*G + g  ->  scale[c] = vT[c % G, c // G]
    v_rows = jnp.dot(pickg, vT, preferred_element_type=jnp.float32)   # (C, S): row c = vT[c%G, :]
    return jnp.sum(v_rows * expand, axis=-1, keepdims=True)           # (C, 1)


# ----------------------------------------------------------------------------
# Single-block-per-batch kernel (whole (C, HW) slab fits the VMEM budget).
# ----------------------------------------------------------------------------
def _channel_gcn_kernel(mask_ref, x2_ref, sel_ref, foldT_ref, pickg_ref,
                        expand_ref, w1_ref, b1_ref, w2t_ref, o_ref, *, approx):
    mask = mask_ref[0].astype(jnp.float32)      # (G, HW) pre-softmax mask
    x2 = x2_ref[0]                              # (C, HW) flattened input

    # softmax over the flattened spatial (lane) axis; reciprocal on the EUP.
    m = jnp.max(mask, axis=-1, keepdims=True)
    e = jnp.exp(mask - m)
    denom = jnp.sum(e, axis=-1, keepdims=True)
    inv = pl.reciprocal(denom, approx=True) if approx else 1.0 / denom
    p = e * inv                                                        # (G, HW)

    # grouped node aggregation: nodes_gc[g, c] = sum_hw p[g, hw] * x2[c, hw]
    # (contraction over the lane axis of both operands -> A @ B^T on the MXU,
    #  no relayout of either operand).
    nodes_gc = jax.lax.dot_general(
        p.astype(x2.dtype), x2, (((1,), (1,)), ((), ())),
        preferred_element_type=jnp.float32)                            # (G, C)

    scale = _gcn_gate_from_nodes(nodes_gc, sel_ref[...], foldT_ref[...],
                                 w1_ref[...], b1_ref[...], w2t_ref[...],
                                 pickg_ref[...], expand_ref[...])       # (C, 1)

    o_ref[0] = (x2 * scale).astype(o_ref.dtype)                         # lane-dense store


# ----------------------------------------------------------------------------
# HW-tiled path, stage 1: online softmax + running (G, C) node accumulation,
# GCN + gate at the last tile.  grid = (B, num_hw_tiles).
# ----------------------------------------------------------------------------
def _stage1_kernel(mask_ref, x2_ref, sel_ref, foldT_ref, pickg_ref, expand_ref,
                   w1_ref, b1_ref, w2t_ref, scale_ref, m_sc, l_sc, acc_sc,
                   *, hw, thw, approx):
    t = pl.program_id(1)

    @pl.when(t == 0)
    def _init():
        m_sc[...] = jnp.full_like(m_sc, -1e30)
        l_sc[...] = jnp.zeros_like(l_sc)
        acc_sc[...] = jnp.zeros_like(acc_sc)

    mask = mask_ref[0].astype(jnp.float32)      # (G, thw)
    x2 = x2_ref[0]                              # (C, thw)

    if hw % thw != 0:
        # Partial last tile: mask the out-of-range lanes in-kernel (one iota +
        # compare + select per vreg) instead of padding in HBM.
        lane = jax.lax.broadcasted_iota(jnp.int32, (1, thw), 1)
        valid = (t * thw + lane) < hw
        mask = jnp.where(valid, mask, -1e30)                 # zero softmax weight
        x2 = jnp.where(valid, x2, jnp.zeros_like(x2))        # zero contribution

    m_prev = m_sc[...]                                        # (G, 1)
    m_new = jnp.maximum(m_prev, jnp.max(mask, axis=-1, keepdims=True))
    alpha = jnp.exp(m_prev - m_new)                           # (G, 1) rescale
    e = jnp.exp(mask - m_new)                                 # (G, thw)
    l_sc[...] = alpha * l_sc[...] + jnp.sum(e, axis=-1, keepdims=True)
    contrib = jax.lax.dot_general(
        e.astype(x2.dtype), x2, (((1,), (1,)), ((), ())),
        preferred_element_type=jnp.float32)                   # (G, C)
    acc_sc[...] = acc_sc[...] * alpha + contrib
    m_sc[...] = m_new

    @pl.when(t == pl.num_programs(1) - 1)
    def _finalize():
        inv_l = pl.reciprocal(l_sc[...], approx=True) if approx else 1.0 / l_sc[...]
        nodes_gc = acc_sc[...] * inv_l                        # (G, C) normalized
        scale_ref[0] = _gcn_gate_from_nodes(
            nodes_gc, sel_ref[...], foldT_ref[...], w1_ref[...], b1_ref[...],
            w2t_ref[...], pickg_ref[...], expand_ref[...])     # (C, 1)


# ----------------------------------------------------------------------------
# HW-tiled path, stage 2: y = x2 * scale (lane-dense streaming gate).
# ----------------------------------------------------------------------------
def _gate_kernel(scale_ref, x2_ref, o_ref):
    o_ref[0] = (x2_ref[0] * scale_ref[0]).astype(o_ref.dtype)


# ----------------------------------------------------------------------------
# Wrapper.
# ----------------------------------------------------------------------------
def _vmem_budget():
    """~80% of the per-core VMEM capacity (v5e/v6e: 128 MiB, v7x: 64 MiB)."""
    try:
        cap = int(pltpu.get_tpu_info().vmem_capacity_bytes)
    except Exception:
        cap = 64 * 1024 * 1024            # conservative (v7x-sized) fallback
    return int(0.8 * cap)


def channel_gcn_pallas(x, conv_w, gcn_w1, gcn_b1, gcn_w2, group, *,
                       stream_dtype=None, approx_softmax=True,
                       force_tile_hw=None):
    """x: (B, C, H, W) NCHW; returns (B, C, H, W) (in stream_dtype if set)."""
    B, C, H, W = x.shape
    G = group
    assert C % G == 0
    S = C // G
    HW = H * W

    # conv_mask as a plain XLA conv in the wrapper (avoids 9x im2col traffic).
    mask = jax.lax.conv_general_dilated(
        x, conv_w, window_strides=(1, 1), padding=((1, 1), (1, 1)),
        dimension_numbers=("NCHW", "OIHW", "NCHW"))            # (B, G, H, W)
    mask2 = mask.reshape(B, G, HW)
    x2 = x.reshape(B, C, HW)
    if stream_dtype is not None:
        mask2 = mask2.astype(stream_dtype)
        x2 = x2.astype(stream_dtype)
    out_dtype = x2.dtype
    dsz = jnp.dtype(out_dtype).itemsize

    # Tiny host-side constant 0/1 selection matrices and reshaped GCN weights,
    # all in the "G on sublanes" orientation (no in-kernel transposes).
    c_idx = np.arange(C)
    sel_gc = jnp.asarray(np.arange(G)[:, None] == (c_idx[None, :] // S), jnp.float32)  # (G, C)
    foldT = jnp.asarray((c_idx[:, None] % S) == np.arange(S)[None, :], jnp.float32)    # (C, S)
    pickg = jnp.asarray((c_idx[:, None] % G) == np.arange(G)[None, :], jnp.float32)    # (C, G)
    expand = jnp.asarray((c_idx[:, None] // G) == np.arange(S)[None, :], jnp.float32)  # (C, S)
    w1 = gcn_w1.astype(jnp.float32)                  # (G, G)
    b1c = gcn_b1.reshape(G, 1).astype(jnp.float32)   # (G, 1)
    w2t = gcn_w2.T.astype(jnp.float32)               # (S, S)

    consts = (sel_gc, foldT, pickg, expand, w1, b1c, w2t)
    const_specs = [pl.BlockSpec(c.shape, lambda *_: (0, 0)) for c in consts]
    const_bytes = sum(int(np.prod(c.shape)) * 4 for c in consts)

    budget = _vmem_budget()
    fudge = 2 * 1024 * 1024                          # compiler-internal scratch headroom

    # Single-block path footprint: double-buffered x2/mask/out blocks + live
    # f32 temporaries (widened mask / e / p / the (C,HW) product) + constants.
    untiled_need = (2 * dsz * HW * (2 * C + G)
                    + 4 * HW * (2 * G + C)
                    + 4 * (G * C + C)
                    + const_bytes + fudge)

    def _tile_need(t_sz):
        s1 = (2 * dsz * t_sz * (C + G)               # double-buffered mask+x2 blocks
              + 4 * t_sz * (C + 2 * G)               # f32 temps: e, masked x2, widened mask
              + 4 * (2 * G * C + C))                 # acc scratch + contrib + scale
        s2 = (2 * dsz * t_sz * 2 * C                 # double-buffered x2 in + out blocks
              + 4 * t_sz * C)                        # f32 product temp
        return max(s1, s2) + const_bytes + fudge

    use_tiled = (force_tile_hw is not None) or (untiled_need > budget)

    if not use_tiled:
        vmem_limit = int(min(budget, max(untiled_need, 32 * 1024 * 1024)))
        out2 = pl.pallas_call(
            functools.partial(_channel_gcn_kernel, approx=approx_softmax),
            out_shape=jax.ShapeDtypeStruct((B, C, HW), out_dtype),
            grid=(B,),
            in_specs=([pl.BlockSpec((1, G, HW), lambda i: (i, 0, 0)),   # mask
                       pl.BlockSpec((1, C, HW), lambda i: (i, 0, 0))]   # x2
                      + const_specs),
            out_specs=pl.BlockSpec((1, C, HW), lambda i: (i, 0, 0)),
            compiler_params=pltpu.CompilerParams(
                dimension_semantics=("parallel",),
                vmem_limit_bytes=vmem_limit),
        )(mask2, x2, *consts)
        return out2.reshape(B, C, H, W)

    # ---------------- HW-tiled two-pass path ----------------
    hw_ceil = ((HW + 127) // 128) * 128
    if force_tile_hw is not None:
        thw = min(int(force_tile_hw), hw_ceil)
        assert thw % 128 == 0 and thw > 0
    else:
        thw = 128
        cand = 256
        while cand <= hw_ceil and _tile_need(cand) <= budget:
            thw = cand
            cand += 128
    # TODO(synk): for extreme C (where even a 128-lane tile exceeds the VMEM
    #             budget) add a channel-tiled grid axis as well.
    nt = pl.cdiv(HW, thw)
    vmem_limit = int(min(budget, max(_tile_need(thw), 32 * 1024 * 1024)))

    scale = pl.pallas_call(
        functools.partial(_stage1_kernel, hw=HW, thw=thw, approx=approx_softmax),
        out_shape=jax.ShapeDtypeStruct((B, C, 1), jnp.float32),
        grid=(B, nt),
        in_specs=([pl.BlockSpec((1, G, thw), lambda b, t: (b, 0, t)),   # mask
                   pl.BlockSpec((1, C, thw), lambda b, t: (b, 0, t))]   # x2
                  + const_specs),
        out_specs=pl.BlockSpec((1, C, 1), lambda b, t: (b, 0, 0)),
        scratch_shapes=[pltpu.VMEM((G, 1), jnp.float32),    # running max
                        pltpu.VMEM((G, 1), jnp.float32),    # running sum
                        pltpu.VMEM((G, C), jnp.float32)],   # running nodes
        compiler_params=pltpu.CompilerParams(
            dimension_semantics=("parallel", "arbitrary"),
            vmem_limit_bytes=vmem_limit),
    )(mask2, x2, *consts)

    out2 = pl.pallas_call(
        _gate_kernel,
        out_shape=jax.ShapeDtypeStruct((B, C, HW), out_dtype),
        grid=(B, nt),
        in_specs=[pl.BlockSpec((1, C, 1), lambda b, t: (b, 0, 0)),      # scale
                  pl.BlockSpec((1, C, thw), lambda b, t: (b, 0, t))],   # x2
        out_specs=pl.BlockSpec((1, C, thw), lambda b, t: (b, 0, t)),
        compiler_params=pltpu.CompilerParams(
            dimension_semantics=("parallel", "parallel"),
            vmem_limit_bytes=vmem_limit),
    )(scale, x2)
    return out2.reshape(B, C, H, W)


# ----------------------------------------------------------------------------
# Plain-JAX reference mirroring the PyTorch forward (for verification).
# ----------------------------------------------------------------------------
def channel_gcn_reference(x, conv_w, gcn_w1, gcn_b1, gcn_w2, group):
    B, C, H, W = x.shape
    G = group
    S = C // G
    mask = jax.lax.conv_general_dilated(
        x, conv_w, window_strides=(1, 1), padding=((1, 1), (1, 1)),
        dimension_numbers=("NCHW", "OIHW", "NCHW"))
    mask = jax.nn.softmax(mask.reshape(B, G, H * W), axis=-1)
    x2 = x.reshape(B, C, H * W)
    cols = [jnp.einsum("bsl,bl->bs", x2[:, g * S:(g + 1) * S, :],
                       mask[:, g, :])[..., None] for g in range(G)]
    nodes = jnp.concatenate(cols, axis=-1)                               # (B, S, G)
    h1 = jnp.einsum("nm,bsm->bsn", gcn_w1, nodes) + gcn_b1[None, None, :]
    h2 = jax.nn.relu(nodes + h1)
    out = jnp.einsum("ts,bsn->btn", gcn_w2, h2)                          # (B, S, G)
    v = jax.nn.sigmoid(out).reshape(B, C, 1, 1)
    return x * v


if __name__ == "__main__":
    GROUP = 4

    def _run_case(B, C, H, W, *, force_tile_hw=None, stream_dtype=None, tol=2e-3):
        S = C // GROUP
        key = jax.random.PRNGKey(0)
        kx, k1, k2, k3, k4 = jax.random.split(key, 5)
        x = jax.random.normal(kx, (B, C, H, W), jnp.float32)
        conv_w = 0.1 * jax.random.normal(k1, (GROUP, C, 3, 3), jnp.float32)  # conv_mask.weight
        gcn_w1 = 0.1 * jax.random.normal(k2, (GROUP, GROUP), jnp.float32)    # gcn.conv1.weight
        gcn_b1 = 0.1 * jax.random.normal(k3, (GROUP,), jnp.float32)          # gcn.conv1.bias
        gcn_w2 = 0.1 * jax.random.normal(k4, (S, S), jnp.float32)            # gcn.conv2.weight

        y = channel_gcn_pallas(x, conv_w, gcn_w1, gcn_b1, gcn_w2, GROUP,
                               force_tile_hw=force_tile_hw, stream_dtype=stream_dtype)
        y = jax.block_until_ready(y).astype(jnp.float32)
        y_ref = channel_gcn_reference(x, conv_w, gcn_w1, gcn_b1, gcn_w2, GROUP)
        if not jnp.allclose(y, y_ref, atol=tol, rtol=tol):
            max_err = float(jnp.max(jnp.abs(y - y_ref)))
            raise AssertionError(
                f"mismatch (B={B},C={C},H={H},W={W},tile={force_tile_hw},"
                f"dtype={stream_dtype}): max abs err={max_err}")

    # 1) single-block-per-batch path (HW = 256, multiple of 128)
    _run_case(2, 8, 16, 16)
    # 2) HW-tiled online-softmax path (forced: 2 tiles of 128 lanes)
    _run_case(2, 8, 16, 16, force_tile_hw=128)
    # 3) unaligned HW (15*15 = 225): no wrapper padding / output slicing
    _run_case(2, 8, 15, 15)
    # 4) unaligned HW + tiled path (partial last tile -> in-kernel iota mask)
    _run_case(2, 8, 15, 15, force_tile_hw=128)
    # 5) optional bf16 streaming I/O (half the HBM traffic); loose tolerance
    _run_case(2, 8, 16, 16, stream_dtype=jnp.bfloat16, tol=1e-1)

    print("KERNEL_OK")
</pallas_src>

<mosaic_0001>
module attributes {stable_mosaic.version = 11 : i64} {
  func.func @_channel_gcn_kernel(%arg0: i32, %arg1: memref<1x4x256xf32, #tpu.memory_space<vmem>>, %arg2: memref<1x8x256xf32, #tpu.memory_space<vmem>>, %arg3: memref<4x8xf32, #tpu.memory_space<vmem>>, %arg4: memref<8x2xf32, #tpu.memory_space<vmem>>, %arg5: memref<8x4xf32, #tpu.memory_space<vmem>>, %arg6: memref<8x2xf32, #tpu.memory_space<vmem>>, %arg7: memref<4x4xf32, #tpu.memory_space<vmem>>, %arg8: memref<4x1xf32, #tpu.memory_space<vmem>>, %arg9: memref<2x2xf32, #tpu.memory_space<vmem>>, %arg10: memref<1x8x256xf32, #tpu.memory_space<vmem>>) attributes {dimension_semantics = [#tpu.dimension_semantics<parallel>], iteration_bounds = array<i64: 2>, scalar_prefetch = 0 : i64, scratch_operands = 0 : i64, tpu.core_type = #tpu.core_type<tc>, window_params = [{transform_indices = @transform_0, window_bounds = array<i64: 1, 4, 256>}, {transform_indices = @transform_1, window_bounds = array<i64: 1, 8, 256>}, {pipeline_mode = #tpu.pipeline_mode<synchronous>, transform_indices = @transform_2, window_bounds = array<i64: 4, 8>}, {pipeline_mode = #tpu.pipeline_mode<synchronous>, transform_indices = @transform_3, window_bounds = array<i64: 8, 2>}, {pipeline_mode = #tpu.pipeline_mode<synchronous>, transform_indices = @transform_4, window_bounds = array<i64: 8, 4>}, {pipeline_mode = #tpu.pipeline_mode<synchronous>, transform_indices = @transform_5, window_bounds = array<i64: 8, 2>}, {pipeline_mode = #tpu.pipeline_mode<synchronous>, transform_indices = @transform_6, window_bounds = array<i64: 4, 4>}, {pipeline_mode = #tpu.pipeline_mode<synchronous>, transform_indices = @transform_7, window_bounds = array<i64: 4, 1>}, {pipeline_mode = #tpu.pipeline_mode<synchronous>, transform_indices = @transform_8, window_bounds = array<i64: 2, 2>}, {transform_indices = @transform_9, window_bounds = array<i64: 1, 8, 256>}]} {
    %c0 = arith.constant 0 : index
    %c0_0 = arith.constant 0 : index
    %c0_1 = arith.constant 0 : index
    %0 = vector.load %arg1[%c0, %c0_0, %c0_1] : memref<1x4x256xf32, #tpu.memory_space<vmem>>, vector<1x4x256xf32>
    %1 = vector.shape_cast %0 : vector<1x4x256xf32> to vector<4x256xf32>
    %c0_2 = arith.constant 0 : index
    %c0_3 = arith.constant 0 : index
    %c0_4 = arith.constant 0 : index
    %2 = vector.load %arg2[%c0_2, %c0_3, %c0_4] : memref<1x8x256xf32, #tpu.memory_space<vmem>>, vector<1x8x256xf32>
    %3 = vector.shape_cast %2 : vector<1x8x256xf32> to vector<8x256xf32>
    %cst = arith.constant dense<0xFF800000> : vector<4xf32>
    %4 = vector.multi_reduction <maximumf>, %1, %cst [1] : vector<4x256xf32> to vector<4xf32>
    %5 = vector.shape_cast %4 : vector<4xf32> to vector<4x1xf32>
    %6 = vector.broadcast %5 : vector<4x1xf32> to vector<4x256xf32>
    %7 = arith.subf %1, %6 : vector<4x256xf32>
    %8 = math.exp %7 : vector<4x256xf32>
    %cst_5 = arith.constant dense<0.000000e+00> : vector<4xf32>
    %9 = vector.multi_reduction <add>, %8, %cst_5 [1] : vector<4x256xf32> to vector<4xf32>
    %10 = vector.shape_cast %9 : vector<4xf32> to vector<4x1xf32>
    %11 = tpu.reciprocal %10 {approx = true} : vector<4x1xf32> -> vector<4x1xf32>
    %12 = vector.broadcast %11 : vector<4x1xf32> to vector<4x256xf32>
    %13 = arith.mulf %8, %12 : vector<4x256xf32>
    %cst_6 = arith.constant dense<0.000000e+00> : vector<4x8xf32>
    %14 = tpu.matmul %13, %3, %cst_6 {dimension_numbers = #tpu.dot_dimension_numbers<[1], [1], [0], [0], [0, 0, 1, 0], [], []>} : vector<4x256xf32>, vector<8x256xf32>, vector<4x8xf32> -> vector<4x8xf32>
    %c0_7 = arith.constant 0 : index
    %c0_8 = arith.constant 0 : index
    %15 = vector.load %arg3[%c0_7, %c0_8] : memref<4x8xf32, #tpu.memory_space<vmem>>, vector<4x8xf32>
    %c0_9 = arith.constant 0 : index
    %c0_10 = arith.constant 0 : index
    %16 = vector.load %arg4[%c0_9, %c0_10] : memref<8x2xf32, #tpu.memory_space<vmem>>, vector<8x2xf32>
    %c0_11 = arith.constant 0 : index
    %c0_12 = arith.constant 0 : index
    %17 = vector.load %arg7[%c0_11, %c0_12] : memref<4x4xf32, #tpu.memory_space<vmem>>, vector<4x4xf32>
    %c0_13 = arith.constant 0 : index
    %c0_14 = arith.constant 0 : index
    %18 = vector.load %arg8[%c0_13, %c0_14] : memref<4x1xf32, #tpu.memory_space<vmem>>, vector<4x1xf32>
    %c0_15 = arith.constant 0 : index
    %c0_16 = arith.constant 0 : index
    %19 = vector.load %arg9[%c0_15, %c0_16] : memref<2x2xf32, #tpu.memory_space<vmem>>, vector<2x2xf32>
    %c0_17 = arith.constant 0 : index
    %c0_18 = arith.constant 0 : index
    %20 = vector.load %arg5[%c0_17, %c0_18] : memref<8x4xf32, #tpu.memory_space<vmem>>, vector<8x4xf32>
    %c0_19 = arith.constant 0 : index
    %c0_20 = arith.constant 0 : index
    %21 = vector.load %arg6[%c0_19, %c0_20] : memref<8x2xf32, #tpu.memory_space<vmem>>, vector<8x2xf32>
    %22 = arith.mulf %14, %15 : vector<4x8xf32>
    %cst_21 = arith.constant dense<0.000000e+00> : vector<4x2xf32>
    %23 = tpu.matmul %22, %16, %cst_21 {dimension_numbers = #tpu.dot_dimension_numbers<[1], [0], [0], [1], [0, 0, 1, 1], [], []>} : vector<4x8xf32>, vector<8x2xf32>, vector<4x2xf32> -> vector<4x2xf32>
    %cst_22 = arith.constant dense<0.000000e+00> : vector<4x2xf32>
    %24 = tpu.matmul %17, %23, %cst_22 {dimension_numbers = #tpu.dot_dimension_numbers<[1], [0], [0], [1], [0, 0, 1, 1], [], []>} : vector<4x4xf32>, vector<4x2xf32>, vector<4x2xf32> -> vector<4x2xf32>
    %25 = vector.broadcast %18 : vector<4x1xf32> to vector<4x2xf32>
    %26 = arith.addf %24, %25 : vector<4x2xf32>
    %27 = arith.addf %23, %26 : vector<4x2xf32>
    %cst_23 = arith.constant 0.000000e+00 : f32
    %28 = vector.broadcast %cst_23 : f32 to vector<4x2xf32>
    %29 = arith.maximumf %27, %28 : vector<4x2xf32>
    %cst_24 = arith.constant dense<0.000000e+00> : vector<4x2xf32>
    %30 = tpu.matmul %29, %19, %cst_24 {dimension_numbers = #tpu.dot_dimension_numbers<[1], [0], [0], [1], [0, 0, 1, 1], [], []>} : vector<4x2xf32>, vector<2x2xf32>, vector<4x2xf32> -> vector<4x2xf32>
    %31 = arith.negf %30 : vector<4x2xf32>
    %32 = math.exp %31 : vector<4x2xf32>
    %cst_25 = arith.constant 1.000000e+00 : f32
    %33 = vector.broadcast %cst_25 : f32 to vector<4x2xf32>
    %34 = arith.addf %33, %32 : vector<4x2xf32>
    %35 = arith.divf %33, %34 : vector<4x2xf32>
    %cst_26 = arith.constant dense<0.000000e+00> : vector<8x2xf32>
    %36 = tpu.matmul %20, %35, %cst_26 {dimension_numbers = #tpu.dot_dimension_numbers<[1], [0], [0], [1], [0, 0, 1, 1], [], []>} : vector<8x4xf32>, vector<4x2xf32>, vector<8x2xf32> -> vector<8x2xf32>
    %37 = arith.mulf %36, %21 : vector<8x2xf32>
    %cst_27 = arith.constant dense<0.000000e+00> : vector<8xf32>
    %38 = vector.multi_reduction <add>, %37, %cst_27 [1] : vector<8x2xf32> to vector<8xf32>
    %39 = vector.shape_cast %38 : vector<8xf32> to vector<8x1xf32>
    %40 = vector.broadcast %39 : vector<8x1xf32> to vector<8x256xf32>
    %41 = arith.mulf %3, %40 : vector<8x256xf32>
    %c0_28 = arith.constant 0 : index
    %c0_29 = arith.constant 0 : index
    %c0_30 = arith.constant 0 : index
    %42 = vector.load %arg10[%c0_28, %c0_29, %c0_30] : memref<1x8x256xf32, #tpu.memory_space<vmem>>, vector<1x8x256xf32>
    %43 = vector.shape_cast %42 : vector<1x8x256xf32> to vector<8x256xf32>
    %44 = vector.shape_cast %41 : vector<8x256xf32> to vector<1x8x256xf32>
    tpu.vector_store %arg10[%c0_28, %c0_29, %c0_30], %44 {strides = array<i32>} : memref<1x8x256xf32, #tpu.memory_space<vmem>>, vector<1x8x256xf32>,
    return
  }
  func.func @transform_0(%arg0: i32) -> (i32, i32, i32) {
    %c0_i32 = arith.constant 0 : i32
    %c0_i32_0 = arith.constant 0 : i32
    %c0_i32_1 = arith.constant 0 : i32
    return %arg0, %c0_i32, %c0_i32_0 : i32, i32, i32
  }
  func.func @transform_1(%arg0: i32) -> (i32, i32, i32) {
    %c0_i32 = arith.constant 0 : i32
    %c0_i32_0 = arith.constant 0 : i32
    %c0_i32_1 = arith.constant 0 : i32
    return %arg0, %c0_i32, %c0_i32_0 : i32, i32, i32
  }
  func.func @transform_2(%arg0: i32) -> (i32, i32) {
    %c0_i32 = arith.constant 0 : i32
    %c0_i32_0 = arith.constant 0 : i32
    %c0_i32_1 = arith.constant 0 : i32
    return %c0_i32, %c0_i32_0 : i32, i32
  }
  func.func @transform_3(%arg0: i32) -> (i32, i32) {
    %c0_i32 = arith.constant 0 : i32
    %c0_i32_0 = arith.constant 0 : i32
    %c0_i32_1 = arith.constant 0 : i32
    return %c0_i32, %c0_i32_0 : i32, i32
  }
  func.func @transform_4(%arg0: i32) -> (i32, i32) {
    %c0_i32 = arith.constant 0 : i32
    %c0_i32_0 = arith.constant 0 : i32
    %c0_i32_1 = arith.constant 0 : i32
    return %c0_i32, %c0_i32_0 : i32, i32
  }
  func.func @transform_5(%arg0: i32) -> (i32, i32) {
    %c0_i32 = arith.constant 0 : i32
    %c0_i32_0 = arith.constant 0 : i32
    %c0_i32_1 = arith.constant 0 : i32
    return %c0_i32, %c0_i32_0 : i32, i32
  }
  func.func @transform_6(%arg0: i32) -> (i32, i32) {
    %c0_i32 = arith.constant 0 : i32
    %c0_i32_0 = arith.constant 0 : i32
    %c0_i32_1 = arith.constant 0 : i32
    return %c0_i32, %c0_i32_0 : i32, i32
  }
  func.func @transform_7(%arg0: i32) -> (i32, i32) {
    %c0_i32 = arith.constant 0 : i32
    %c0_i32_0 = arith.constant 0 : i32
    %c0_i32_1 = arith.constant 0 : i32
    return %c0_i32, %c0_i32_0 : i32, i32
  }
  func.func @transform_8(%arg0: i32) -> (i32, i32) {
    %c0_i32 = arith.constant 0 : i32
    %c0_i32_0 = arith.constant 0 : i32
    %c0_i32_1 = arith.constant 0 : i32
    return %c0_i32, %c0_i32_0 : i32, i32
  }
  func.func @transform_9(%arg0: i32) -> (i32, i32, i32) {
    %c0_i32 = arith.constant 0 : i32
    %c0_i32_0 = arith.constant 0 : i32
    %c0_i32_1 = arith.constant 0 : i32
    return %arg0, %c0_i32, %c0_i32_0 : i32, i32, i32
  }
}

</mosaic_0001>

<bundles_post_ra>
// kernel: tpu_custom_call.1
= control target key start
LH: loop header
LB: loop body
LE: loop exit
PB: predicated region body
PF: predicated region fallthrough
CT: control target
= control target key end

     0   :  { %14 = vsyncpa [#allocation3], 0  ;;  %s1120_s0 = inlined_call_operand.vmem [shape: f32[2,4,256], index: 0, kind: input, shape index: {}]   ;;  %s1121_s1 = inlined_call_operand.hbm [shape: f32[2,8,256], index: 1, kind: input, shape index: {}]   ;;  %s1122_s2 = inlined_call_operand.vmem [shape: f32[4,8], index: 2, kind: input, shape index: {}]   ;;  %s1123_s3 = inlined_call_operand.vmem [shape: f32[8,2], index: 3, kind: input, shape index: {}]   ;;  %s1124_s4 = inlined_call_operand.vmem [shape: f32[8,4], index: 4, kind: input, shape index: {}]   ;;  %s1125_s5 = inlined_call_operand.vmem [shape: f32[8,2], index: 5, kind: input, shape index: {}]   ;;  %s1126_s6 = inlined_call_operand.vmem [shape: f32[4,4], index: 6, kind: input, shape index: {}]   ;;  %s1127_s7 = inlined_call_operand.vmem [shape: f32[4,1], index: 7, kind: input, shape index: {}]   ;;  %s1128_s8 = inlined_call_operand.vmem [shape: f32[2,2], index: 8, kind: input, shape index: {}]   ;;  %s1129_s9 = inlined_call_operand.hbm [shape: f32[2,8,256], index: 9, kind: output, shape index: {}]  }
   0x1   :  { %16 = vsyncpa [#allocation3 + $0x1], 0 }
   0x2   :  { %17 = vsyncpa [#allocation4], 0 }
   0x3   :  { %19 = vsyncpa [#allocation4 + $0x1], 0  ;;  %s941_s30 = smov 0   ;;  %s943_s10 = smov 0  }
   0x4   :  { %s945_s11 = smov 0   ;;  %s947_s12 = smov 0  }
   0x5 LB: > { %1133 = sst [smem:[#allocation8_spill]] %s883_s11  ;;  %s962_s13 = sadd.s32 4294967295, %s887_s12   ;;  %s887_s12 = sphi %s947_s12, %s1142_s12   ;;  %s883_s11 = sphi %s945_s11, %s1144_s11   ;;  %s879_s10 = sphi %s943_s10, %s1146_s10   ;;  %s875_s30 = sphi %s941_s30, %s1145_s30  }
   0x6   : > { %s706_s14 = sadd.s32 4294967294, %s887_s12   ;;  %s966_s15 = sadd.s32 1, %s887_s12  }
   0x7   : > { %1134 = sst [smem:[#allocation9_spill]] %s966_s15  ;;  %s58_s16 = sadd.s32 1, %s883_s11 }
   0x8   : > { %s55_s17 = ssub.s32 %s887_s12, %s966_s15  ;;  %p65_p0 = scmp.ne.s32.totalorder %s883_s11, %s879_s10 }
   0x9   : > { %p56_p1 = scmp.eq.s32.totalorder %s55_s17, 0  ;;  %p66_p2 = scmp.eq.s32.totalorder %s887_s12, 0 }
   0xa   : > { %p71_p3 = scmp.ne.s32.totalorder %s879_s10, %s875_s30  ;;  %p72_p4 = scmp.eq.s32.totalorder %s962_s13, 0 }
   0xb   : > { %s978_s18 = scalar_select %p56_p1, %s883_s11, %s58_s16  }
   0xc   : > { %p980_p5 = por %p66_p2, %p65_p0  ;;  %p984_p6 = por %p72_p4, %p71_p3 }
   0xd   : > { %1135 = sst [smem:[#allocation10_spill]] %s978_s18  ;;  %p242_p7 = scmp.eq.s32.totalorder %s962_s13, 1 }
   0xe   : > { %p248_p8 = scmp.eq.s32.totalorder %s706_s14, 1  ;;  %p745_p10 = scmp.lt.s32.totalorder %s887_s12, 2 }
   0xf   : > { %p991_p11 = por %p242_p7, %p65_p0  ;;  %s297_s23 = sand.u32 1, %s883_s11  }
  0x10   : > { %p995_p12 = por %p248_p8, %p71_p3  ;;  %s730_s24 = sshll.u32 %s887_s12, 4 }
  0x11   : > { %s709_s25 = sshll.u32 %s297_s23, 4  ;;  %s306_s28 = scalar_lea.hbm %s1121_s1, %s730_s24 }
  0x12   : > { %s308_s29 = sshll.u32 %s306_s28, 4  ;;  %s301_s14 = scalar_lea.vmem [#allocation2], %s709_s25  ;;  %s309_s29 = int_to_ptr.hbm [resolvable:$true] %s308_s29 }
  0x13   : > { %s310_s16 = sshll.u32 %s301_s14, 4  ;;  %p1006_p13 = pnand %p745_p10, %p980_p5  ;;  %s311_s16 = int_to_ptr.vmem [resolvable:$true] %s310_s16 }
  0x14   : > { %p712_p0 = scmp.ge.s32.totalorder %s887_s12, 1  ;;  %p315_p1 = scmp.lt.s32.totalorder %s887_s12, 3 }
  0x15   : > { %s298_s18 = scalar_lea.sflag [#allocation3], %s297_s23  ;;  %s791_s11 = sshra.s32 %s309_s29, 4  ;;  %s792_s11 = int_to_ptr.hbm [resolvable:$true] %s791_s11 }
  0x16   : > { %s793_s15 = scalar_lea.hbm %s792_s11, 16  ;;  %p795_p3 = pneg %p1006_p13 }
  0x17   : > { %p794_p2 = scmp.ne.s32.totalorder %s792_s11, %s793_s15  ;;  %s798_s19 = scalar_lea.hbm %s1121_s1, 32 }
  0x18   : > { %p799_p5 = scmp.lt.s32.totalorder %s792_s11, %s1121_s1  ;;  %p800_p8 = scmp.lt.s32.totalorder %s798_s19, %s793_s15 }
  0x19   : > { %p796_p4 = pnand %p795_p3, %p794_p2 }
  0x1a   : > { %p801_p10 = por %p800_p8, %p799_p5 }
  0x1b   : > { %p797_p7 = pneg %p796_p4 }
  0x1d   : > { %p802_p9 = pnand %p801_p10, %p797_p7 }
  0x1f   : > { %805 = shalt.err (!%p802_p9)
}
  0x20   : > { %740 = dma.hbm_to_vmem [thread:$0]  (!%p1006_p13), %s309_s29, 256, %s311_s16, %s298_s18  }
  0x21   : > { %p316_p2 = pnand %p712_p0, %p315_p1 }
  0x22   : > { %s1027_s23 = sand.u32 (!%p316_p2), 1, %s879_s10  }
  0x23   : > { %319 = sbr.rel (%p316_p2) target bundleno = 1153 (0x481), region = 56  ;;  %s713_s11 = sshll.u32 (!%p316_p2), %s1027_s23, 4 }
  0x24   : > { %s322_s15 = scalar_lea.sflag (!%p316_p2), [#allocation3], %s1027_s23  ;;  %s1033_s28 = scalar_lea.vmem (!%p316_p2), [#allocation2], %s713_s11 }
  0x28   : > { %866 = dma.done.wait (%p984_p6), %s322_s15, 256  }
  0x29   : > { %868 = vsyncadd (%p984_p6), %s322_s15, 4294967040  ;;  %p366_p9 = scmp.lt.s32.totalorder %s962_s13, 1  ;;  %vm380_vm0 = vcmask 1043456   ;;  %v889_v6 = vmov 839922192   ;;  %v1049_v19 = vld [vmem:[%s1033_s28] sm:$0xff] }
  0x2a   : > { %v388_v7 = vunpack.c.l.s4 %v889_v6  ;;  %v1052_v20 = vld [vmem:[%s1033_s28 + $0x8] sm:$0xff]  ;;  %435 = vmatpush.xpose.msra.mxu0 %v1049_v19  ;;  %vm468_vm1 = vcmask 64512   ;;  %v890_v34 = vmov 0   ;;  %vm497_vm2 = vcmask 31744   ;;  %s732_s24 = sshll.u32 %s962_s13, 4  ;;  %s365_s27 = scalar_lea.vmem [#allocation5], %s713_s11 }
  0x2b   : > { %s367_s18 = scalar_select %p366_p9, %s962_s13, 1  ;;  %455 = vmatpush.xpose.msra.mxu1 %v1052_v20  ;;  %v461_v27 = vld [vmem:[%s1123_s3] sm:$0xff]  ;;  %781 = vset.pattern.permute.xlu1 %v890_v34  ;;  %vm530_vm3 = vcmask 1041408   ;;  %vm526_vm4 = vcmask 15360  }
  0x2c   : > { %v389_v8 = vunpack.c.0.s8 %v388_v7  ;;  %487 = vmatpush.msra.mxu2 %v461_v27  ;;  %v460_v30 = vld [vmem:[%s1122_s2] sm:$0xf]  ;;  %782 = vset.pattern.permute.xlu0 %v890_v34  ;;  %s619_s26 = scalar_lea.hbm %s1129_s9, %s732_s24  ;;  %s621_s15 = sshll.u32 %s365_s27, 4  ;;  %s622_s15 = int_to_ptr.vmem [resolvable:$true] %s621_s15 }
  0x2d   : > { %s731_s29 = sshll.u32 %s367_s18, 3  ;;  %v463_v33 = vld [vmem:[%s1127_s7] sm:$0xf]  ;;  %s623_s28 = sshll.u32 %s619_s26, 4  ;;  %s624_s28 = int_to_ptr.hbm [resolvable:$true] %s623_s28 }
  0x2e   : > { %s370_s17 = scalar_lea.vmem %s1120_s0, %s731_s29  ;;  %494 = vperm.xlu1 %781, %v463_v33   ;;  %v462_v35 = vld [vmem:[%s1126_s6] sm:$0xf]  ;;  %s608_s18 = scalar_lea.sflag [#allocation4], %s1027_s23 }
  0x2f   : > { %v371_v0 = vld [vmem:[%s370_s17] sm:$0xff]  ;;  %s835_s13 = sshra.s32 %s624_s28, 4  ;;  %s841_s16 = scalar_lea.hbm %s1129_s9, 32  ;;  %s836_s13 = int_to_ptr.hbm [resolvable:$true] %s835_s13 }
  0x30   : > { %375 = vst [vmem:[#allocation1] ss:$2 sm:$0xff] %v371_v0  ;;  %v464_v37 = vld [vmem:[%s1128_s8] sm:$0x3]  ;;  %s837_s29 = scalar_lea.hbm %s836_s13, 16  ;;  %p842_p1 = scmp.lt.s32.totalorder %s836_s13, %s1129_s9 }
  0x31   : > { %720 = vmatpush.msk.msrb.mxu2 %vm530_vm3, %v464_v37  ;;  %v465_v56 = vld [vmem:[%s1124_s4] sm:$0xff]  ;;  %p838_p6 = scmp.ne.s32.totalorder %s836_s13, %s837_s29  ;;  %p843_p3 = scmp.lt.s32.totalorder %s841_s16, %s837_s29 }
  0x32   : > { %v466_v58 = vld [vmem:[%s1125_s5] sm:$0xff] }
  0x33   : > { %p839_p13 = pnand %p838_p6, %p991_p11  ;;  %p844_p4 = por %p843_p3, %p842_p1 }
  0x35   : > { %p840_p0 = pneg %p839_p13 }
  0x37   : > { %v376_v1 = vld.sshfl [vmem:[#allocation1] sm:$0xff pattern:$0x75316420]  ;;  %v377_v2 = vld.sshfl [vmem:[#allocation1 + $0x8] sm:$0xff pattern:$0x75316420]  ;;  %p845_p7 = pnand %p844_p4, %p840_p0 }
  0x38   : > { %v381_v3 = vsel %vm380_vm0, %v376_v1, -inf  ;;  %v382_v4 = vsel %vm380_vm0, %v377_v2, -inf }
  0x39   : > { %v383_v5 = vmax.f32 %v381_v3, %v382_v4 }
  0x3b   : > { %384 = vmax.xlane.f32.xlu0 %v383_v5 }
  0xa0   : > { %v495_v38 = vpop.permute.xlu1 %494 }
  0xae   : > { %v385_v9 = vpop.xlane.xlu0 %384 }
  0xaf   : > { %v390_v10 = vperm.slane %v385_v9, %v389_v8 }
  0xb1   : > { %v392_v11 = vsub.f32 %v371_v0, %v390_v10 }
  0xb3   : > { %v393_v12 = vmul.f32 1.442695, %v392_v11 }
  0xb5   : > { %783 = vpow2.f32 %v393_v12 }
  0xbb   : > { %v784_v13 = vpop.eup %783 }
  0xbc   : > { %396 = vst [vmem:[#allocation1] ss:$2 sm:$0xff] %v784_v13 }
  0xc3   : > { %v397_v14 = vld.sshfl [vmem:[#allocation1] sm:$0xff pattern:$0x75316420]  ;;  %v398_v15 = vld.sshfl [vmem:[#allocation1 + $0x8] sm:$0xff pattern:$0x75316420] }
  0xc4   : > { %v401_v16 = vsel %vm380_vm0, %v397_v14, 0.0  ;;  %v402_v17 = vsel %vm380_vm0, %v398_v15, 0.0 }
  0xc5   : > { %v403_v18 = vadd.f32 %v402_v17, %v401_v16 }
  0xc7   : > { %404 = vadd.xlane.f32.xlu0 %v403_v18 }
 0x13a   : > { %v405_v21 = vpop.xlane.xlu0 %404 }
 0x13b   : > { %785 = vrcp.f32 %v405_v21 }
 0x141   : > { %v786_v22 = vpop.eup %785 }
 0x142   : > { %v411_v23 = vperm.slane %v786_v22, %v389_v8 }
 0x144   : > { %v413_v24 = vmul.f32 %v784_v13, %v411_v23 }
 0x146   : > { %415 = vst [vmem:[#allocation1] ss:$2 sm:$0xff] %v413_v24 }
 0x14d   : > { %v416_v25 = vld.sshfl [vmem:[#allocation1] sm:$0xff pattern:$0x75316420]  ;;  %v417_v26 = vld.sshfl [vmem:[#allocation1 + $0x8] sm:$0xff pattern:$0x75316420] }
 0x14e   : > { %436 = vmatmul.f32.vlgmr.msra.gmra.mxu0 %v416_v25  ;;  %456 = vmatmul.f32.vlgmr.msra.gmra.mxu1 %v417_v26 }
 0x1cb   : > { %v437_v28 = vpop.f32.mrf.mxu0  ;;  %v457_v29 = vpop.f32.mrf.mxu1 }
 0x1cc   : > { %v458_v31 = vadd.f32 %v457_v29, %v437_v28 }
 0x1ce   : > { %v467_v32 = vmul.f32 %v460_v30, %v458_v31 }
 0x1d0   : > { %717 = vmatmul.msk.f32.vlgmr.msra.gmra.mxu2 %vm468_vm1, %v467_v32 }
 0x253   : > { %v489_v36 = vpop.f32.mrf.mxu2 }
 0x254   : > { %718 = vmatpush.msk.msra.mxu3 %vm380_vm0, %v489_v36 }
 0x255   : > { %719 = vmatmul.msk.f32.vlgmr.msra.gmra.mxu3 %vm497_vm2, %v462_v35 }
 0x2d8   : > { %v521_v39 = vpop.f32.mrf.mxu3 }
 0x2d9   : > { %v522_v40 = vadd.f32 %v521_v39, %v495_v38 }
 0x2db   : > { %v524_v41 = vadd.f32 %v522_v40, %v489_v36 }
 0x2dd   : > { %v525_v42 = vmax.f32 %v524_v41, 0.0 }
 0x2df   : > { %721 = vmatmul.msk.f32.vlgmr.msrb.gmra.mxu2 %vm526_vm4, %v525_v42 }
 0x362   : > { %v551_v43 = vpop.f32.mrf.mxu2 }
 0x363   : > { %v722_v44 = vmul.f32 -1.442695, %v551_v43 }
 0x365   : > { %787 = vpow2.f32 %v722_v44 }
 0x36b   : > { %v788_v45 = vpop.eup %787 }
 0x36c   : > { %v557_v46 = vadd.f32 1.0, %v788_v45 }
 0x36e   : > { %789 = vrcp.f32 %v557_v46  ;;  %v569_v50 = vand.u32 2147483648, %v557_v46  ;;  %v567_v52 = vand.u32 2147483647, %v557_v46  ;;  %vm563_vm6 = vweird.f32 %v557_v46 }
 0x370   : > { %v570_v54 = vor.u32 1.1754944e-38, %v569_v50  ;;  %vm568_vm8 = vcmp.eq.f32.partialorder %v567_v52, 8.507059e+37 }
 0x374   : > { %v790_v47 = vpop.eup %789 }
 0x375   : > { %v559_v48 = vmul.f32 %v790_v47, %v557_v46  ;;  %vm564_vm5 = vweird.f32 %v790_v47 }
 0x376   : > { %vm565_vm7 = vmor %vm563_vm6, %vm564_vm5 }
 0x377   : > { %v560_v49 = vsub.f32 1.0, %v559_v48 }
 0x379   : > { %v561_v51 = vmul.f32 %v790_v47, %v560_v49 }
 0x37b   : > { %v562_v53 = vadd.f32 %v790_v47, %v561_v51 }
 0x37d   : > { %v566_v55 = vsel %vm565_vm7, %v790_v47, %v562_v53 }
 0x37e   : > { %v571_v57 = vsel %vm568_vm8, %v570_v54, %v566_v55 }
 0x37f   : > { %723 = vmatpush.msk.msrb.mxu3 %vm380_vm0, %v571_v57 }
 0x380   : > { %724 = vmatmul.msk.f32.vlgmr.msrb.gmra.mxu3 %vm497_vm2, %v465_v56 }
 0x403   : > { %v596_v59 = vpop.f32.mrf.mxu3 }
 0x404   : > { %v599_v60 = vmul.f32 %v596_v59, %v466_v58 }
 0x406   : > { %v600_v61 = vsel %vm526_vm4, %v599_v60, 0.0 }
 0x407   : > { %601 = vadd.xlane.f32.xlu1 %v600_v61 }
 0x47a   : > { %v602_v62 = vpop.xlane.xlu1 %601 }
 0x47b   : > { %v603_v63 = vmul.f32 %v602_v62, %v1049_v19  ;;  %v604_v0 = vmul.f32 %v602_v62, %v1052_v20 }
 0x47d   : > { %605 = vst [vmem:[%s365_s27] sm:$0xff] %v603_v63 }
 0x47e   : > { %606 = vst [vmem:[%s365_s27 + $0x8] sm:$0xff] %v604_v0 }
 0x47f   : > { %848 = shalt.err (!%p845_p7)
}
 0x480   : > { %735 = dma.vmem_to_hbm [thread:$0]  (%p991_p11), %s622_s15, 256, %s624_s28, %s608_s18  }
 0x481 PF: > { %s635_s23 = sand.u32 1, %s875_s30   ;;  %p1141_p5 = scmp.ge.s32.totalorder %s887_s12, 2 }
 0x482   : > { %s636_s24 = scalar_lea.sflag [#allocation4], %s635_s23 }
 0x483   : > { %p742_p8 = pnand %p1141_p5, %p995_p12 }
 0x485   : > { %p743_p10 = pneg %p742_p8 }
 0x487   : > { %870 = dma.done.wait (%p743_p10), %s636_s24, 256  }
 0x488   : > { %872 = vsyncadd (%p743_p10), %s636_s24, 4294967040  ;;  %s1142_s12 = sld [smem:[#allocation9_spill]]  ;;  %s1145_s30 = smov %s879_s10 }
 0x489   : > { %s1143_s25 = sld [smem:[#allocation8_spill]] }
 0x48a   : > { %s1144_s11 = sld [smem:[#allocation10_spill]] }
 0x48e   : > { %p22_p2 = scmp.ge.s32.totalorder %s1142_s12, 4  }
 0x48f   : > { %s1146_s10 = smov %s1143_s25 }
 0x490   :  { %24 = sbr.rel (!%p22_p2) target bundleno = 5 (0x5), region = 104 }
 0x495   :  { %642 = vsyncpa [#allocation3], 1 }
 0x496   :  { %644 = vsyncpa [#allocation3 + $0x1], 1 }
 0x497   :  { %645 = vsyncpa [#allocation4], 1 }
 0x498   :  { %647 = vsyncpa [#allocation4 + $0x1], 1 }

</bundles_post_ra>
